<compile_context>
chip_gen: v7x
topology: tpu7x:2x2x1
jax: 0.10.0
libtpu: 0.0.40
codegen_flags: <defaults>
</compile_context>

<pallas_src>
import functools

import jax
import jax.numpy as jnp
from jax.experimental import pallas as pl
from jax.experimental.pallas import tpu as pltpu


def _snn_conv_kernel(x_ref, w_ref, m_ref, b_ref, o_ref, xpad_ref, col_ref,
                     *, K, W, HW, pad, Cin):
    """One image per grid step, flat-NCHW layout (channels on sublanes, H*W on lanes).

    x_ref   : (1, Cin, HW)            flattened input image
    w_ref   : (Cout, K*K*Cin)         im2col-ordered weight matrix
    m_ref   : (K, HW)                 per-kw column-validity masks (W borders)
    b_ref   : (Cout, 1)               bias column
    o_ref   : (1, Cout, HW)           flattened output image (lane-dense last dim)
    xpad_ref: (Cin, L) VMEM scratch,  L = (H + 2*pad)*W + 2*pad
    col_ref : (K*K*Cin, HW) VMEM scratch, im2col tile
    """
    # In-kernel zero padding (replaces a wrapper-side jnp.pad HBM pass):
    # zero the scratch, then place the image at flat offset pad*W + pad.
    # Re-zeroed every grid step so it is safe under "parallel" core sharding.
    xpad_ref[...] = jnp.zeros(xpad_ref.shape, xpad_ref.dtype)
    xpad_ref[:, pl.ds(pad * W + pad, HW)] = x_ref[0]

    # Border masks loaded once (K rows) and reused across all kh.
    masks = [m_ref[pl.ds(kw, 1), :] for kw in range(K)]          # each (1, HW)

    # Build the im2col tile: row block t*Cin..t*Cin+Cin holds tap t = kh*K+kw.
    # xpad[:, j + kh*W + kw] == x[:, h+kh-pad, w+kw-pad] whenever in range; the
    # H-pad zeros handle out-of-range rows, the per-kw mask kills the lanes
    # whose flat shift wrapped across a row boundary (W borders).
    for kh in range(K):
        for kw in range(K):
            t = kh * K + kw
            patch = xpad_ref[:, pl.ds(kh * W + kw, HW)]          # (Cin, HW)
            col_ref[pl.ds(t * Cin, Cin), :] = patch * masks[kw]

    # Single MXU dot for the whole conv of this image.
    acc = jnp.dot(w_ref[...], col_ref[...],                      # (Cout, HW)
                  preferred_element_type=jnp.float32)
    acc = acc + b_ref[...]                                       # (Cout,1) lane bcast
    o_ref[0] = acc.astype(o_ref.dtype)


def snn_conv_forward(x_nchw, weight_oihw, bias):
    """SNNConv.forward (default flags) — Pallas TPU implementation.

    x_nchw:      [N, C_in, H, W]   (PyTorch NCHW)
    weight_oihw: [C_out, C_in, K, K]
    bias:        [C_out]
    returns:     [N, C_out, H, W]
    """
    N, Cin, H, W = x_nchw.shape
    Cout, Cin_w, K, K2 = weight_oihw.shape
    assert Cin_w == Cin and K == K2
    # Matches SNNConv default padding=(kernel_size-1)//2; only odd K gives the
    # "same" spatial size that this kernel produces.
    assert K % 2 == 1, "only odd kernel_size is supported"
    pad = (K - 1) // 2
    HW = H * W
    L = (H + 2 * pad) * W + 2 * pad   # flat H-padded length (+pad slack at both ends)

    # Free reshape for the activations — the kernel consumes/produces NCHW directly.
    x_flat = x_nchw.reshape(N, Cin, HW)
    # im2col-ordered weight matrix: w_mat[o, (kh*K+kw)*Cin + c] = W[o, c, kh, kw].
    w_mat = jnp.transpose(weight_oihw, (0, 2, 3, 1)).reshape(Cout, K * K * Cin)
    b_col = bias.reshape(Cout, 1).astype(jnp.float32)

    # Per-kw column-validity masks (tiny, K*HW): zero lanes whose shifted read
    # corresponds to the zero padding at the left/right image borders.
    w_idx = jnp.arange(HW, dtype=jnp.int32) % W
    col_masks = jnp.stack(
        [(w_idx + kw - pad >= 0) & (w_idx + kw - pad < W) for kw in range(K)]
    ).astype(x_flat.dtype)                                       # (K, HW)

    kernel = functools.partial(_snn_conv_kernel, K=K, W=W, HW=HW, pad=pad, Cin=Cin)

    out_flat = pl.pallas_call(
        kernel,
        out_shape=jax.ShapeDtypeStruct((N, Cout, HW), x_nchw.dtype),
        grid_spec=pltpu.PrefetchScalarGridSpec(
            num_scalar_prefetch=0,
            grid=(N,),
            in_specs=[
                pl.BlockSpec((1, Cin, HW), lambda b: (b, 0, 0)),
                pl.BlockSpec((Cout, K * K * Cin), lambda b: (0, 0)),
                pl.BlockSpec((K, HW), lambda b: (0, 0)),
                pl.BlockSpec((Cout, 1), lambda b: (0, 0)),
            ],
            out_specs=pl.BlockSpec((1, Cout, HW), lambda b: (b, 0, 0)),
            scratch_shapes=[
                pltpu.VMEM((Cin, L), x_nchw.dtype),          # padded image
                pltpu.VMEM((K * K * Cin, HW), x_nchw.dtype), # im2col tile
            ],
        ),
        compiler_params=pltpu.CompilerParams(
            dimension_semantics=("parallel",),
        ),
    )(x_flat, w_mat, col_masks, b_col)

    return out_flat.reshape(N, Cout, H, W)


def init_snn_conv_params(key, d_in, d_out, kernel_size):
    """Reproduce SNNConv._initialize_weights deterministically:
    weight ~ U(-1, 1), then each output-channel filter is L2-normalized;
    bias = 0.
    """
    w = jax.random.uniform(
        key, (d_out, d_in, kernel_size, kernel_size),
        minval=-1.0, maxval=1.0, dtype=jnp.float32,
    )
    norms = jnp.sqrt(jnp.sum(w * w, axis=(1, 2, 3), keepdims=True))
    w = w / norms
    b = jnp.zeros((d_out,), dtype=jnp.float32)
    return w, b


if __name__ == "__main__":
    key = jax.random.PRNGKey(0)
    k_x, k_w = jax.random.split(key)

    # Small shapes: batch=2, d_in=4, d_out=8, spatial=16, kernel_size=3.
    N, Cin, H, W = 2, 4, 16, 16
    Cout, K = 8, 3

    x = jax.random.normal(k_x, (N, Cin, H, W), dtype=jnp.float32)
    weight, bias = init_snn_conv_params(k_w, Cin, Cout, K)

    out = snn_conv_forward(x, weight, bias)
    out = jax.block_until_ready(out)

    # Reference check against XLA's conv (same semantics as PyTorch nn.Conv2d).
    p = (K - 1) // 2
    ref = jax.lax.conv_general_dilated(
        x, weight,
        window_strides=(1, 1),
        padding=((p, p), (p, p)),
        dimension_numbers=("NCHW", "OIHW", "NCHW"),
        precision=jax.lax.Precision.HIGHEST,
    ) + bias.reshape(1, Cout, 1, 1)

    assert out.shape == (N, Cout, H, W)
    max_err = float(jnp.max(jnp.abs(out - ref)))
    assert jnp.allclose(out, ref, atol=1e-3, rtol=1e-3), f"max abs err = {max_err}"

    print("KERNEL_OK")
</pallas_src>

<mosaic_0001>
module attributes {stable_mosaic.version = 11 : i64} {
  func.func @_snn_conv_kernel(%arg0: i32, %arg1: memref<1x4x256xf32, #tpu.memory_space<vmem>>, %arg2: memref<8x36xf32, #tpu.memory_space<vmem>>, %arg3: memref<3x256xf32, #tpu.memory_space<vmem>>, %arg4: memref<8x1xf32, #tpu.memory_space<vmem>>, %arg5: memref<1x8x256xf32, #tpu.memory_space<vmem>>, %arg6: memref<4x290xf32, #tpu.memory_space<vmem>>, %arg7: memref<36x256xf32, #tpu.memory_space<vmem>>) attributes {dimension_semantics = [#tpu.dimension_semantics<parallel>], iteration_bounds = array<i64: 2>, scalar_prefetch = 0 : i64, scratch_operands = 2 : i64, tpu.core_type = #tpu.core_type<tc>, window_params = [{transform_indices = @transform_0, window_bounds = array<i64: 1, 4, 256>}, {pipeline_mode = #tpu.pipeline_mode<synchronous>, transform_indices = @transform_1, window_bounds = array<i64: 8, 36>}, {pipeline_mode = #tpu.pipeline_mode<synchronous>, transform_indices = @transform_2, window_bounds = array<i64: 3, 256>}, {pipeline_mode = #tpu.pipeline_mode<synchronous>, transform_indices = @transform_3, window_bounds = array<i64: 8, 1>}, {transform_indices = @transform_4, window_bounds = array<i64: 1, 8, 256>}]} {
    %cst = arith.constant 0.000000e+00 : f32
    %0 = vector.broadcast %cst : f32 to vector<4x290xf32>
    %c0 = arith.constant 0 : index
    %c0_0 = arith.constant 0 : index
    %1 = vector.load %arg6[%c0, %c0_0] : memref<4x290xf32, #tpu.memory_space<vmem>>, vector<4x290xf32>
    tpu.vector_store %arg6[%c0, %c0_0], %0 {strides = array<i32>} : memref<4x290xf32, #tpu.memory_space<vmem>>, vector<4x290xf32>,
    %c0_1 = arith.constant 0 : index
    %c0_2 = arith.constant 0 : index
    %c0_3 = arith.constant 0 : index
    %2 = vector.load %arg1[%c0_1, %c0_2, %c0_3] : memref<1x4x256xf32, #tpu.memory_space<vmem>>, vector<1x4x256xf32>
    %3 = vector.shape_cast %2 : vector<1x4x256xf32> to vector<4x256xf32>
    %c0_4 = arith.constant 0 : index
    %c17 = arith.constant 17 : index
    %4 = vector.load %arg6[%c0_4, %c17] : memref<4x290xf32, #tpu.memory_space<vmem>>, vector<4x256xf32>
    tpu.vector_store %arg6[%c0_4, %c17], %3 {strides = array<i32>} : memref<4x290xf32, #tpu.memory_space<vmem>>, vector<4x256xf32>,
    %c0_5 = arith.constant 0 : index
    %c0_6 = arith.constant 0 : index
    %5 = vector.load %arg3[%c0_5, %c0_6] : memref<3x256xf32, #tpu.memory_space<vmem>>, vector<1x256xf32>
    %c1 = arith.constant 1 : index
    %c0_7 = arith.constant 0 : index
    %6 = vector.load %arg3[%c1, %c0_7] : memref<3x256xf32, #tpu.memory_space<vmem>>, vector<1x256xf32>
    %c2 = arith.constant 2 : index
    %c0_8 = arith.constant 0 : index
    %7 = vector.load %arg3[%c2, %c0_8] : memref<3x256xf32, #tpu.memory_space<vmem>>, vector<1x256xf32>
    %c0_9 = arith.constant 0 : index
    %c0_10 = arith.constant 0 : index
    %8 = vector.load %arg6[%c0_9, %c0_10] : memref<4x290xf32, #tpu.memory_space<vmem>>, vector<4x256xf32>
    %9 = vector.broadcast %5 : vector<1x256xf32> to vector<4x256xf32>
    %10 = arith.mulf %8, %9 : vector<4x256xf32>
    %c0_11 = arith.constant 0 : index
    %c0_12 = arith.constant 0 : index
    %11 = vector.load %arg7[%c0_11, %c0_12] : memref<36x256xf32, #tpu.memory_space<vmem>>, vector<4x256xf32>
    tpu.vector_store %arg7[%c0_11, %c0_12], %10 {strides = array<i32>} : memref<36x256xf32, #tpu.memory_space<vmem>>, vector<4x256xf32>,
    %c0_13 = arith.constant 0 : index
    %c1_14 = arith.constant 1 : index
    %12 = vector.load %arg6[%c0_13, %c1_14] : memref<4x290xf32, #tpu.memory_space<vmem>>, vector<4x256xf32>
    %13 = vector.broadcast %6 : vector<1x256xf32> to vector<4x256xf32>
    %14 = arith.mulf %12, %13 : vector<4x256xf32>
    %c4 = arith.constant 4 : index
    %c0_15 = arith.constant 0 : index
    %15 = vector.load %arg7[%c4, %c0_15] : memref<36x256xf32, #tpu.memory_space<vmem>>, vector<4x256xf32>
    tpu.vector_store %arg7[%c4, %c0_15], %14 {strides = array<i32>} : memref<36x256xf32, #tpu.memory_space<vmem>>, vector<4x256xf32>,
    %c0_16 = arith.constant 0 : index
    %c2_17 = arith.constant 2 : index
    %16 = vector.load %arg6[%c0_16, %c2_17] : memref<4x290xf32, #tpu.memory_space<vmem>>, vector<4x256xf32>
    %17 = vector.broadcast %7 : vector<1x256xf32> to vector<4x256xf32>
    %18 = arith.mulf %16, %17 : vector<4x256xf32>
    %c8 = arith.constant 8 : index
    %c0_18 = arith.constant 0 : index
    %19 = vector.load %arg7[%c8, %c0_18] : memref<36x256xf32, #tpu.memory_space<vmem>>, vector<4x256xf32>
    tpu.vector_store %arg7[%c8, %c0_18], %18 {strides = array<i32>} : memref<36x256xf32, #tpu.memory_space<vmem>>, vector<4x256xf32>,
    %c0_19 = arith.constant 0 : index
    %c16 = arith.constant 16 : index
    %20 = vector.load %arg6[%c0_19, %c16] : memref<4x290xf32, #tpu.memory_space<vmem>>, vector<4x256xf32>
    %21 = vector.broadcast %5 : vector<1x256xf32> to vector<4x256xf32>
    %22 = arith.mulf %20, %21 : vector<4x256xf32>
    %c12 = arith.constant 12 : index
    %c0_20 = arith.constant 0 : index
    %23 = vector.load %arg7[%c12, %c0_20] : memref<36x256xf32, #tpu.memory_space<vmem>>, vector<4x256xf32>
    tpu.vector_store %arg7[%c12, %c0_20], %22 {strides = array<i32>} : memref<36x256xf32, #tpu.memory_space<vmem>>, vector<4x256xf32>,
    %c0_21 = arith.constant 0 : index
    %c17_22 = arith.constant 17 : index
    %24 = vector.load %arg6[%c0_21, %c17_22] : memref<4x290xf32, #tpu.memory_space<vmem>>, vector<4x256xf32>
    %25 = vector.broadcast %6 : vector<1x256xf32> to vector<4x256xf32>
    %26 = arith.mulf %24, %25 : vector<4x256xf32>
    %c16_23 = arith.constant 16 : index
    %c0_24 = arith.constant 0 : index
    %27 = vector.load %arg7[%c16_23, %c0_24] : memref<36x256xf32, #tpu.memory_space<vmem>>, vector<4x256xf32>
    tpu.vector_store %arg7[%c16_23, %c0_24], %26 {strides = array<i32>} : memref<36x256xf32, #tpu.memory_space<vmem>>, vector<4x256xf32>,
    %c0_25 = arith.constant 0 : index
    %c18 = arith.constant 18 : index
    %28 = vector.load %arg6[%c0_25, %c18] : memref<4x290xf32, #tpu.memory_space<vmem>>, vector<4x256xf32>
    %29 = vector.broadcast %7 : vector<1x256xf32> to vector<4x256xf32>
    %30 = arith.mulf %28, %29 : vector<4x256xf32>
    %c20 = arith.constant 20 : index
    %c0_26 = arith.constant 0 : index
    %31 = vector.load %arg7[%c20, %c0_26] : memref<36x256xf32, #tpu.memory_space<vmem>>, vector<4x256xf32>
    tpu.vector_store %arg7[%c20, %c0_26], %30 {strides = array<i32>} : memref<36x256xf32, #tpu.memory_space<vmem>>, vector<4x256xf32>,
    %c0_27 = arith.constant 0 : index
    %c32 = arith.constant 32 : index
    %32 = vector.load %arg6[%c0_27, %c32] : memref<4x290xf32, #tpu.memory_space<vmem>>, vector<4x256xf32>
    %33 = vector.broadcast %5 : vector<1x256xf32> to vector<4x256xf32>
    %34 = arith.mulf %32, %33 : vector<4x256xf32>
    %c24 = arith.constant 24 : index
    %c0_28 = arith.constant 0 : index
    %35 = vector.load %arg7[%c24, %c0_28] : memref<36x256xf32, #tpu.memory_space<vmem>>, vector<4x256xf32>
    tpu.vector_store %arg7[%c24, %c0_28], %34 {strides = array<i32>} : memref<36x256xf32, #tpu.memory_space<vmem>>, vector<4x256xf32>,
    %c0_29 = arith.constant 0 : index
    %c33 = arith.constant 33 : index
    %36 = vector.load %arg6[%c0_29, %c33] : memref<4x290xf32, #tpu.memory_space<vmem>>, vector<4x256xf32>
    %37 = vector.broadcast %6 : vector<1x256xf32> to vector<4x256xf32>
    %38 = arith.mulf %36, %37 : vector<4x256xf32>
    %c28 = arith.constant 28 : index
    %c0_30 = arith.constant 0 : index
    %39 = vector.load %arg7[%c28, %c0_30] : memref<36x256xf32, #tpu.memory_space<vmem>>, vector<4x256xf32>
    tpu.vector_store %arg7[%c28, %c0_30], %38 {strides = array<i32>} : memref<36x256xf32, #tpu.memory_space<vmem>>, vector<4x256xf32>,
    %c0_31 = arith.constant 0 : index
    %c34 = arith.constant 34 : index
    %40 = vector.load %arg6[%c0_31, %c34] : memref<4x290xf32, #tpu.memory_space<vmem>>, vector<4x256xf32>
    %41 = vector.broadcast %7 : vector<1x256xf32> to vector<4x256xf32>
    %42 = arith.mulf %40, %41 : vector<4x256xf32>
    %c32_32 = arith.constant 32 : index
    %c0_33 = arith.constant 0 : index
    %43 = vector.load %arg7[%c32_32, %c0_33] : memref<36x256xf32, #tpu.memory_space<vmem>>, vector<4x256xf32>
    tpu.vector_store %arg7[%c32_32, %c0_33], %42 {strides = array<i32>} : memref<36x256xf32, #tpu.memory_space<vmem>>, vector<4x256xf32>,
    %c0_34 = arith.constant 0 : index
    %c0_35 = arith.constant 0 : index
    %44 = vector.load %arg2[%c0_34, %c0_35] : memref<8x36xf32, #tpu.memory_space<vmem>>, vector<8x36xf32>
    %c0_36 = arith.constant 0 : index
    %c0_37 = arith.constant 0 : index
    %45 = vector.load %arg7[%c0_36, %c0_37] : memref<36x256xf32, #tpu.memory_space<vmem>>, vector<36x256xf32>
    %cst_38 = arith.constant dense<0.000000e+00> : vector<8x256xf32>
    %46 = tpu.matmul %44, %45, %cst_38 {dimension_numbers = #tpu.dot_dimension_numbers<[1], [0], [0], [1], [0, 0, 1, 1], [], []>} : vector<8x36xf32>, vector<36x256xf32>, vector<8x256xf32> -> vector<8x256xf32>
    %c0_39 = arith.constant 0 : index
    %c0_40 = arith.constant 0 : index
    %47 = vector.load %arg4[%c0_39, %c0_40] : memref<8x1xf32, #tpu.memory_space<vmem>>, vector<8x1xf32>
    %48 = vector.broadcast %47 : vector<8x1xf32> to vector<8x256xf32>
    %49 = arith.addf %46, %48 : vector<8x256xf32>
    %c0_41 = arith.constant 0 : index
    %c0_42 = arith.constant 0 : index
    %c0_43 = arith.constant 0 : index
    %50 = vector.load %arg5[%c0_41, %c0_42, %c0_43] : memref<1x8x256xf32, #tpu.memory_space<vmem>>, vector<1x8x256xf32>
    %51 = vector.shape_cast %50 : vector<1x8x256xf32> to vector<8x256xf32>
    %52 = vector.shape_cast %49 : vector<8x256xf32> to vector<1x8x256xf32>
    tpu.vector_store %arg5[%c0_41, %c0_42, %c0_43], %52 {strides = array<i32>} : memref<1x8x256xf32, #tpu.memory_space<vmem>>, vector<1x8x256xf32>,
    return
  }
  func.func @transform_0(%arg0: i32) -> (i32, i32, i32) {
    %c0_i32 = arith.constant 0 : i32
    %c0_i32_0 = arith.constant 0 : i32
    %c0_i32_1 = arith.constant 0 : i32
    return %arg0, %c0_i32, %c0_i32_0 : i32, i32, i32
  }
  func.func @transform_1(%arg0: i32) -> (i32, i32) {
    %c0_i32 = arith.constant 0 : i32
    %c0_i32_0 = arith.constant 0 : i32
    %c0_i32_1 = arith.constant 0 : i32
    return %c0_i32, %c0_i32_0 : i32, i32
  }
  func.func @transform_2(%arg0: i32) -> (i32, i32) {
    %c0_i32 = arith.constant 0 : i32
    %c0_i32_0 = arith.constant 0 : i32
    %c0_i32_1 = arith.constant 0 : i32
    return %c0_i32, %c0_i32_0 : i32, i32
  }
  func.func @transform_3(%arg0: i32) -> (i32, i32) {
    %c0_i32 = arith.constant 0 : i32
    %c0_i32_0 = arith.constant 0 : i32
    %c0_i32_1 = arith.constant 0 : i32
    return %c0_i32, %c0_i32_0 : i32, i32
  }
  func.func @transform_4(%arg0: i32) -> (i32, i32, i32) {
    %c0_i32 = arith.constant 0 : i32
    %c0_i32_0 = arith.constant 0 : i32
    %c0_i32_1 = arith.constant 0 : i32
    return %arg0, %c0_i32, %c0_i32_0 : i32, i32, i32
  }
}

</mosaic_0001>

<bundles_post_ra>
// kernel: tpu_custom_call.1
= control target key start
LH: loop header
LB: loop body
LE: loop exit
PB: predicated region body
PF: predicated region fallthrough
CT: control target
= control target key end

     0   :  { %9 = vsyncpa [#allocation5], 0  ;;  %s1145_s0 = inlined_call_operand.hbm [shape: f32[2,4,256], index: 0, kind: input, shape index: {}]   ;;  %s1146_s1 = inlined_call_operand.vmem [shape: f32[8,36], index: 1, kind: input, shape index: {}]   ;;  %s1147_s2 = inlined_call_operand.vmem [shape: f32[3,256], index: 2, kind: input, shape index: {}]   ;;  %s1148_s3 = inlined_call_operand.vmem [shape: f32[8,1], index: 3, kind: input, shape index: {}]   ;;  %s1149_s4 = inlined_call_operand.hbm [shape: f32[2,8,256], index: 4, kind: output, shape index: {}]  }
   0x1   :  { %11 = vsyncpa [#allocation5 + $0x1], 0 }
   0x2   :  { %12 = vsyncpa [#allocation6], 0 }
   0x3   :  { %14 = vsyncpa [#allocation6 + $0x1], 0  ;;  %s918_s15 = smov 0   ;;  %s920_s16 = smov 0  }
   0x4   :  { %s922_s17 = smov 0   ;;  %s924_s18 = smov 0  }
   0x5 LB: > { %s939_s19 = sadd.s32 4294967295, %s871_s18   ;;  %s680_s20 = sadd.s32 4294967294, %s871_s18   ;;  %s871_s18 = sphi %s924_s18, %s1164_s18   ;;  %s867_s17 = sphi %s922_s17, %s1163_s17   ;;  %s863_s16 = sphi %s920_s16, %s1162_s16   ;;  %s859_s15 = sphi %s918_s15, %s1161_s15  }
   0x6   : > { %s943_s21 = sadd.s32 1, %s871_s18   ;;  %s27_s22 = sadd.s32 1, %s867_s17 }
   0x7   : > { %s24_s23 = ssub.s32 %s871_s18, %s943_s21  ;;  %p34_p0 = scmp.ne.s32.totalorder %s867_s17, %s863_s16 }
   0x8   : > { %p25_p1 = scmp.eq.s32.totalorder %s24_s23, 0  ;;  %p35_p2 = scmp.eq.s32.totalorder %s871_s18, 0 }
   0x9   : > { %p40_p3 = scmp.ne.s32.totalorder %s863_s16, %s859_s15  ;;  %p41_p4 = scmp.eq.s32.totalorder %s939_s19, 0 }
   0xa   : > { %s955_s24 = scalar_select %p25_p1, %s867_s17, %s27_s22  }
   0xb   : > { %p957_p5 = por %p35_p2, %p34_p0  ;;  %p961_p6 = por %p41_p4, %p40_p3 }
   0xc   : > { %p127_p7 = scmp.eq.s32.totalorder %s939_s19, 1  ;;  %p133_p8 = scmp.eq.s32.totalorder %s680_s20, 1 }
   0xd   : > { %p721_p10 = scmp.lt.s32.totalorder %s871_s18, 2  ;;  %s162_s29 = sand.u32 1, %s867_s17  }
   0xe   : > { %p968_p11 = por %p127_p7, %p34_p0  ;;  %p972_p12 = por %p133_p8, %p40_p3 }
   0xf   : > { %s699_s30 = sshll.u32 %s871_s18, 7  ;;  %s683_s5 = sshll.u32 %s162_s29, 3 }
  0x10   : > { %s1153_s27 = scalar_select %p968_p11, 1, 0 }
  0x11   : > { %s1154_s28 = scalar_select %p972_p12, 1, 0 }
  0x12   : > { %s981_s8 = scalar_lea.hbm %s1145_s0, %s699_s30  ;;  %s166_s9 = scalar_lea.vmem [#allocation4], %s683_s5 }
  0x13   : > { %s174_s10 = sshll.u32 %s166_s9, 4  ;;  %p985_p13 = pnand %p721_p10, %p957_p5  ;;  %s989_s10 = int_to_ptr.vmem [resolvable:$true] %s174_s10 }
  0x14   : > { %s163_s12 = scalar_lea.sflag [#allocation5], %s162_s29  ;;  %s775_s13 = scalar_lea.hbm %s981_s8, 128 }
  0x15   : > { %p776_p2 = scmp.ne.s32.totalorder %s981_s8, %s775_s13  ;;  %p777_p3 = pneg %p985_p13 }
  0x16   : > { %s780_s22 = scalar_lea.hbm %s1145_s0, 256  ;;  %p781_p5 = scmp.lt.u32.totalorder %s981_s8, %s1145_s0 }
  0x17   : > { %p778_p4 = pnand %p777_p3, %p776_p2  ;;  %p782_p8 = scmp.lt.u32.totalorder %s780_s22, %s775_s13 }
  0x18   : > { %p784_p9 = scmp.lt.u32.totalorder %s775_s13, %s981_s8 }
  0x19   : > { %p779_p7 = pneg %p778_p4  ;;  %p783_p10 = por %p782_p8, %p781_p5 }
  0x1b   : > { %p785_p0 = por %p784_p9, %p783_p10 }
  0x1d   : > { %p786_p1 = pnand %p785_p0, %p779_p7 }
  0x1f   : > { %789 = shalt.err (!%p786_p1)
}
  0x20   : > { %s790_s29 = scalar_lea.vmem %s989_s10, 128  ;;  %s873_s30 = smov [#allocation4]  }
  0x21   : > { %p791_p2 = scmp.ne.s32.totalorder %s989_s10, %s790_s29  ;;  %s795_s5 = sshll.u32 %s873_s30, 4  ;;  %s796_s5 = int_to_ptr.vmem [resolvable:$false] %s795_s5 }
  0x22   : > { %s797_s6 = scalar_lea.vmem %s796_s5, 256  ;;  %p798_p11 = scmp.lt.s32.totalorder %s989_s10, %s796_s5 }
  0x23   : > { %p793_p4 = pnand %p791_p2, %p777_p3  ;;  %p799_p5 = scmp.lt.s32.totalorder %s797_s6, %s790_s29 }
  0x25   : > { %p794_p12 = pneg %p793_p4  ;;  %p800_p8 = por %p799_p5, %p798_p11 }
  0x27   : > { %p801_p9 = pnand %p800_p8, %p794_p12 }
  0x29   : > { %804 = shalt.err (!%p801_p9)
}
  0x2a   : > { %716 = dma.hbm_to_vmem [thread:$0]  (!%p985_p13), %s981_s8, 128, %s989_s10, %s163_s12  }
  0x2b   : > { %p1156_p0 = scmp.lt.s32.totalorder %s871_s18, 3  ;;  %p1157_p1 = scmp.ge.s32.totalorder %s871_s18, 1 }
  0x2d   : > { %p180_p3 = pnand %p1157_p1, %p1156_p0 }
  0x2e   : > { %s1023_s7 = sand.u32 (!%p180_p3), 1, %s863_s16  }
  0x2f   : > { %183 = sbr.rel (%p180_p3) target bundleno = 588 (0x24c), region = 36  ;;  %s687_s9 = sshll.u32 (!%p180_p3), %s1023_s7, 3 }
  0x30   : > { %s186_s13 = scalar_lea.sflag (!%p180_p3), [#allocation5], %s1023_s7  ;;  %s189_s14 = scalar_lea.vmem (!%p180_p3), [#allocation4], %s687_s9 }
  0x36   : > { %850 = dma.done.wait (%p961_p6), %s186_s13, 128  }
  0x37   : > { %852 = vsyncadd (%p961_p6), %s186_s13, 4294967168  ;;  %v239_v0 = vlaneseq  ;;  %vm215_vm0 = vcmask 273408   ;;  %v874_v1 = vmov 0.0   ;;  %v217_v5 = vld [vmem:[%s189_s14] sm:$0xff]  ;;  %s875_s11 = smov 17   ;;  %s876_s23 = smov 1  }
  0x38   : > { %214 = vst [vmem:[#allocation2] sm:$0xff] %v874_v1  ;;  %216 = vst.msk [vmem:[#allocation2 + $0x8] sm:$0xf] %vm215_vm0, %v874_v1  ;;  %586 = vmatprep.mubr.f32.mxu0 %v874_v1  ;;  %v689_v6 = vld [vmem:[%s1147_s2 + $0x1] ss:$4 sm:$0x3]  ;;  %219 = vrot.lane.b32.xlu0 %v217_v5, %s875_s11 }
  0x39   : > { %v240_v2 = vshrl.u32 %v239_v0, 7  ;;  %v690_v9 = vld [vmem:[%s1147_s2 + $0x2] ss:$4 sm:$0x3]  ;;  %s877_s25 = smov 2   ;;  %s878_s29 = smov 16  }
  0x3a   : > { %v232_v10 = vld [vmem:[%s1147_s2] ss:$4 sm:$0x3]  ;;  %s879_s30 = smov 32   ;;  %s880_s5 = smov 18   ;;  %vm226_vm1 = vcmask 1043592  }
  0x3b   : > { %v241_v3 = vsub.s32 0, %v240_v2  ;;  %v245_v4 = vsub.s32 1, %v240_v2  ;;  %s881_s6 = smov 33   ;;  %s882_s9 = smov 34   ;;  %vm227_vm2 = vcmask 1047556   ;;  %vm222_vm3 = vcmask 138240  }
  0x3c   : > { %vm230_vm4 = vcmask 134144   ;;  %vm228_vm5 = vmor %vm227_vm2, %vm226_vm1  ;;  %vm308_vm6 = vcmask 15360   ;;  %vm389_vm7 = vcmask 146432   ;;  %s883_s13 = smov 126   ;;  %s884_s14 = smov 111   ;;  %vm444_vm8 = vcmask 269312  }
  0x3d   : > { %v261_v7 = vrot.slane %v689_v6, %v241_v3  ;;  %v265_v8 = vrot.slane %v689_v6, %v245_v4  ;;  %v299_v11 = vrot.slane %v690_v9, %v241_v3  ;;  %v303_v12 = vrot.slane %v690_v9, %v245_v4  ;;  %s885_s8 = smov 96   ;;  %s886_s10 = smov 110  }
  0x3e   : > { %v242_v13 = vrot.slane %v232_v10, %v241_v3  ;;  %v246_v14 = vrot.slane %v232_v10, %v245_v4  ;;  %vm270_vm9 = vcmask 7168   ;;  %vm335_vm10 = vcmask 130048   ;;  %s888_s26 = smov 95   ;;  %s889_s12 = smov 112  }
  0x3f   : > { %v266_v15 = vcombine.low %v261_v7, %v265_v8  ;;  %v304_v16 = vcombine.low %v299_v11, %v303_v12  ;;  %vm417_vm11 = vcmask 261120   ;;  %vm472_vm12 = vcmask 277504   ;;  %s890_s20 = smov 94   ;;  %p1158_p11 = scmp.ne.s32.totalorder %s1153_s27, 0 }
  0x40   : > { %v247_v17 = vcombine.low %v242_v13, %v246_v14  ;;  %vm405_vm13 = vcmask 900096   ;;  %vm460_vm14 = vcmask 777216   ;;  %vm286_vm15 = vcmask 1039360  }
  0x41   : > { %267 = vrot.lane.b32.xlu1 %v266_v15, %s876_s23  ;;  %305 = vrot.lane.b32.xlu0 %v304_v16, %s877_s25  ;;  %vm323_vm0 = vcmask 1031168   ;;  %vm351_vm1 = vcmask 916480   ;;  %vm377_vm2 = vcmask 908288  }
  0x45   : > { %332 = vrot.lane.b32.xlu1 %v247_v17, %s878_s29  ;;  %360 = vrot.lane.b32.xlu0 %v266_v15, %s875_s11  ;;  %s887_s11 = smov 127  }
  0x49   : > { %414 = vrot.lane.b32.xlu1 %v247_v17, %s879_s30  ;;  %386 = vrot.lane.b32.xlu0 %v304_v16, %s880_s5  ;;  %s688_s30 = sshll.u32 %s1023_s7, 4  ;;  %s700_s5 = sshll.u32 %s939_s19, 8 }
  0x4d   : > { %441 = vrot.lane.b32.xlu1 %v266_v15, %s881_s6  ;;  %469 = vrot.lane.b32.xlu0 %v304_v16, %s882_s9  ;;  %s213_s6 = scalar_lea.vmem [#allocation7], %s688_s30 }
  0x4e   : > { %s610_s9 = sshll.u32 %s213_s6, 4  ;;  %s1103_s9 = int_to_ptr.vmem [resolvable:$true] %s610_s9 }
  0x4f   : > { %s805_s19 = scalar_lea.vmem %s1103_s9, 256 }
  0x50   : > { %p806_p6 = scmp.ne.s32.totalorder %s1103_s9, %s805_s19 }
  0x52   : > { %p807_p12 = pnand %p806_p6, %p1158_p11 }
  0x54   : > { %p808_p13 = pneg %p807_p12 }
  0xaa   : > { %v220_v18 = vpop.permute.xlu0 %219 }
  0xab   : > { %v221_v19 = vrot.slane %v220_v18, 4 }
  0xad   : > { %v223_v20 = vsel %vm222_vm3, %v221_v19, %v220_v18  ;;  %231 = vst.msk [vmem:[#allocation2 + $0x8] sm:$0xf] %vm230_vm4, %v221_v19  ;;  %vm487_vm4 = vcmask 769024  }
  0xae   : > { %229 = vst.msk [vmem:[#allocation2] sm:$0xff] %vm228_vm5, %v223_v20  ;;  %v891_v20 = vmov 0   ;;  %vm515_vm5 = vcmask 1043456  }
  0xaf   : > { %774 = vset.pattern.permute.xlu0 %v891_v20  ;;  %773 = vset.pattern.permute.xlu1 %v891_v20 }
  0xb3   : > { %v1041_v21 = vpop.permute.xlu1 %267  ;;  %v306_v22 = vpop.permute.xlu0 %305 }
  0xb4   : > { %v307_v24 = vrot.slane %v306_v22, 4  ;;  %v294_v26 = vld [vmem:[#allocation2 + $0x8] sm:$0xf]  ;;  %v269_v43 = vrot.slane %v1041_v21, 4 }
  0xb5   : > { %v1045_v27 = vld [vmem:[#allocation2] sm:$0xff]  ;;  %v359_v29 = vld [vmem:[#allocation2 + $0x8] sm:$0xf] }
  0xb6   : > { %v313_v28 = vmul.f32 %v307_v24, %v294_v26  ;;  %v249_v34 = vmul.f32 %v247_v17, %v1045_v27  ;;  %v309_v35 = vsel %vm308_vm6, %v307_v24, %v306_v22  ;;  %v413_v39 = vld [vmem:[#allocation2 + $0x8] sm:$0xf]  ;;  %v271_v49 = vsel %vm270_vm9, %v269_v43, %v1041_v21  ;;  %v505_v21 = vld [vmem:[%s1148_s3] sm:$0xff] }
  0xb7   : > { %v1043_v23 = vpop.permute.xlu1 %332  ;;  %v361_v25 = vpop.permute.xlu0 %360  ;;  %v312_v38 = vmul.f32 %v309_v35, %v1045_v27  ;;  %v274_v50 = vmul.f32 %v271_v49, %v1045_v27  ;;  %v385_v54 = vld [vmem:[#allocation2 + $0x8] sm:$0xf]  ;;  %vm511_vm6 = vcmask 293888  }
  0xb8   : > { %v362_v30 = vrot.slane %v361_v25, 4  ;;  %321 = vrot.lane.b32.xlu0 %v313_v28, %s883_s13  ;;  %253 = vst [vmem:[#allocation3] sm:$0xf] %v249_v34  ;;  %v251_v45 = vcombine.high %v249_v34, %v249_v34  ;;  %v334_v46 = vrot.slane %v1043_v23, 4  ;;  %v256_v58 = vld [vmem:[#allocation2 + $0x8] sm:$0xf] }
  0xb9   : > { %v440_v60 = vld [vmem:[#allocation2 + $0x8] sm:$0xf]  ;;  %v275_v63 = vmul.f32 %v269_v43, %v256_v58  ;;  %v316_v6 = vcombine.high %v312_v38, %v312_v38  ;;  %v278_v9 = vcombine.low %v274_v50, %v274_v50 }
  0xba   : > { %v367_v36 = vmul.f32 %v362_v30, %v359_v29  ;;  %254 = vst [vmem:[#allocation3 + $0x8] sm:$0xf] %v251_v45  ;;  %v336_v51 = vsel %vm335_vm10, %v334_v46, %v1043_v23  ;;  %v363_v53 = vsel %vm222_vm3, %v362_v30, %v361_v25  ;;  %v331_v1 = vld [vmem:[#allocation2 + $0x8] sm:$0xf]  ;;  %vm432_vm3 = vcmask 785408  }
  0xbb   : > { %v415_v31 = vpop.permute.xlu1 %414  ;;  %v387_v33 = vpop.permute.xlu0 %386  ;;  %v339_v55 = vmul.f32 %v336_v51, %v1045_v27  ;;  %v366_v57 = vmul.f32 %v363_v53, %v1045_v27  ;;  %v340_v3 = vmul.f32 %v334_v46, %v331_v1  ;;  %v279_v4 = vcombine.low %v275_v63, %v275_v63  ;;  %v468_v18 = vld [vmem:[#allocation2 + $0x8] sm:$0xf] }
  0xbc   : > { %v416_v32 = vrot.slane %v415_v31, 4  ;;  %v388_v37 = vrot.slane %v387_v33, 4  ;;  %375 = vrot.lane.b32.xlu1 %v367_v36, %s884_s14  ;;  %317 = vrot.lane.b32.xlu0 %v312_v38, %s883_s13 }
  0xbd   : > { %v344_v7 = vcombine.low %v340_v3, %v340_v3  ;;  %v370_v10 = vcombine.high %v366_v57, %v366_v57  ;;  %v343_v12 = vcombine.low %v339_v55, %v339_v55 }
  0xbe   : > { %v422_v40 = vmul.f32 %v416_v32, %v413_v39  ;;  %v390_v41 = vsel %vm389_vm7, %v388_v37, %v387_v33  ;;  %v394_v56 = vmul.f32 %v388_v37, %v385_v54  ;;  %v418_v59 = vsel %vm417_vm11, %v416_v32, %v415_v31 }
  0xbf   : > { %v442_v42 = vpop.permute.xlu1 %441  ;;  %v393_v47 = vmul.f32 %v390_v41, %v1045_v27  ;;  %v421_v0 = vmul.f32 %v418_v59, %v1045_v27  ;;  %v470_v5 = vpop.permute.xlu0 %469 }
  0xc0   : > { %v443_v44 = vrot.slane %v442_v42, 4  ;;  %430 = vrot.lane.b32.xlu1 %v422_v40, %s885_s8  ;;  %v398_v62 = vcombine.low %v394_v56, %v394_v56  ;;  %v471_v8 = vrot.slane %v470_v5, 4 }
  0xc1   : > { %401 = vrot.lane.b32.xlu0 %v393_v47, %s886_s10  ;;  %v425_v14 = vcombine.high %v421_v0, %v421_v0  ;;  %v397_v15 = vcombine.low %v393_v47, %v393_v47 }
  0xc2   : > { %v445_v48 = vsel %vm444_vm8, %v443_v44, %v442_v42  ;;  %v449_v61 = vmul.f32 %v443_v44, %v440_v60  ;;  %v473_v11 = vsel %vm472_vm12, %v471_v8, %v470_v5  ;;  %v477_v19 = vmul.f32 %v471_v8, %v468_v18 }
  0xc3   : > { %v448_v52 = vmul.f32 %v445_v48, %v1045_v27  ;;  %v476_v13 = vmul.f32 %v473_v11, %v1045_v27  ;;  %v494_v11 = vld [vmem:[%s1146_s1] sm:$0xff] }
  0xc4   : > { %282 = vrot.lane.b32.xlu1 %v274_v50, %s887_s11  ;;  %v453_v2 = vcombine.low %v449_v61, %v449_v61 }
  0xc5   : > { %456 = vrot.lane.b32.xlu0 %v448_v52, %s888_s26  ;;  %v480_v16 = vcombine.high %v476_v13, %v476_v13  ;;  %v452_v17 = vcombine.low %v448_v52, %v448_v52 }
  0xc8   : > { %347 = vrot.lane.b32.xlu1 %v339_v55, %s889_s12 }
  0xc9   : > { %371 = vrot.lane.b32.xlu0 %v366_v57, %s884_s14 }
  0xcc   : > { %403 = vrot.lane.b32.xlu1 %v398_v62, %s886_s10 }
  0xcd   : > { %426 = vrot.lane.b32.xlu0 %v421_v0, %s885_s8 }
  0xd0   : > { %458 = vrot.lane.b32.xlu1 %v453_v2, %s888_s26 }
  0xd1   : > { %284 = vrot.lane.b32.xlu0 %v279_v4, %s887_s11 }
  0xd4   : > { %319 = vrot.lane.b32.xlu1 %v316_v6, %s883_s13 }
  0xd5   : > { %349 = vrot.lane.b32.xlu0 %v344_v7, %s889_s12 }
  0xd8   : > { %280 = vrot.lane.b32.xlu1 %v278_v9, %s887_s11  ;;  %s892_s11 = smov [#allocation7]  }
  0xd9   : > { %373 = vrot.lane.b32.xlu0 %v370_v10, %s884_s14 }
  0xdc   : > { %345 = vrot.lane.b32.xlu1 %v343_v12, %s889_s12 }
  0xdd   : > { %428 = vrot.lane.b32.xlu0 %v425_v14, %s885_s8  ;;  %s1101_s8 = scalar_lea.hbm %s1149_s4, %s700_s5 }
  0xe0   : > { %399 = vrot.lane.b32.xlu1 %v397_v15, %s886_s10  ;;  %s596_s10 = scalar_lea.sflag [#allocation6], %s1023_s7 }
  0xe1   : > { %483 = vrot.lane.b32.xlu0 %v480_v16, %s890_s20 }
  0xe4   : > { %454 = vrot.lane.b32.xlu1 %v452_v17, %s888_s26  ;;  %s809_s26 = sshll.u32 %s892_s11, 4  ;;  %s810_s26 = int_to_ptr.vmem [resolvable:$false] %s809_s26 }
  0xe5   : > { %481 = vrot.lane.b32.xlu0 %v476_v13, %s890_s20  ;;  %s811_s12 = scalar_lea.vmem %s810_s26, 512  ;;  %p812_p7 = scmp.lt.s32.totalorder %s1103_s9, %s810_s26 }
  0xe6   : > { %p813_p10 = scmp.lt.s32.totalorder %s811_s12, %s805_s19 }
  0xe8   : > { %485 = vrot.lane.b32.xlu1 %v477_v19, %s890_s20  ;;  %p814_p2 = por %p813_p10, %p812_p7 }
  0xea   : > { %p815_p4 = pnand %p814_p2, %p808_p13 }
  0xec   : > { %508 = vperm.xlu1 %773, %v505_v21  }
 0x12a   : > { %v322_v22 = vpop.permute.xlu0 %321 }
 0x12e   : > { %v376_v23 = vpop.permute.xlu1 %375  ;;  %v318_v24 = vpop.permute.xlu0 %317 }
 0x132   : > { %v431_v25 = vpop.permute.xlu1 %430 }
 0x133   : > { %v402_v26 = vpop.permute.xlu0 %401 }
 0x136   : > { %v283_v27 = vpop.permute.xlu1 %282 }
 0x137   : > { %v457_v28 = vpop.permute.xlu0 %456 }
 0x13a   : > { %v348_v29 = vpop.permute.xlu1 %347 }
 0x13b   : > { %v372_v30 = vpop.permute.xlu0 %371 }
 0x13e   : > { %v404_v31 = vpop.permute.xlu1 %403 }
 0x13f   : > { %v407_v32 = vsel %vm405_vm13, %v402_v26, %v404_v31  ;;  %v427_v33 = vpop.permute.xlu0 %426 }
 0x140   : > { %411 = vst [vmem:[#allocation3 + $0x28] sm:$0xf0] %v407_v32 }
 0x142   : > { %v459_v34 = vpop.permute.xlu1 %458 }
 0x143   : > { %v462_v35 = vsel %vm460_vm14, %v457_v28, %v459_v34  ;;  %v285_v36 = vpop.permute.xlu0 %284 }
 0x144   : > { %466 = vst [vmem:[#allocation3 + $0x38] sm:$0xf0] %v462_v35  ;;  %v288_v37 = vsel %vm286_vm15, %v283_v27, %v285_v36 }
 0x145   : > { %292 = vst [vmem:[#allocation3 + $0x8] sm:$0xf0] %v288_v37 }
 0x146   : > { %v320_v38 = vpop.permute.xlu1 %319 }
 0x147   : > { %v324_v39 = vsel %vm323_vm0, %v318_v24, %v320_v38  ;;  %v325_v40 = vsel %vm323_vm0, %v320_v38, %v322_v22  ;;  %v350_v41 = vpop.permute.xlu0 %349 }
 0x148   : > { %328 = vst [vmem:[#allocation3 + $0x10] sm:$0xf] %v324_v39  ;;  %329 = vst [vmem:[#allocation3 + $0x18] sm:$0xf] %v325_v40  ;;  %v353_v42 = vsel %vm351_vm1, %v348_v29, %v350_v41 }
 0x149   : > { %357 = vst [vmem:[#allocation3 + $0x18] sm:$0xf0] %v353_v42 }
 0x14a   : > { %v281_v43 = vpop.permute.xlu1 %280 }
 0x14b   : > { %v287_v44 = vsel %vm286_vm15, %v281_v43, %v283_v27  ;;  %v374_v45 = vpop.permute.xlu0 %373 }
 0x14c   : > { %291 = vst [vmem:[#allocation3] sm:$0xf0] %v287_v44  ;;  %v378_v46 = vsel %vm377_vm2, %v372_v30, %v374_v45  ;;  %v379_v47 = vsel %vm377_vm2, %v374_v45, %v376_v23  ;;  %v496_v53 = vld [vmem:[#allocation3 + $0x8] sm:$0xff] }
 0x14d   : > { %382 = vst [vmem:[#allocation3 + $0x20] sm:$0xf] %v378_v46  ;;  %383 = vst [vmem:[#allocation3 + $0x28] sm:$0xf] %v379_v47 }
 0x14e   : > { %v346_v48 = vpop.permute.xlu1 %345 }
 0x14f   : > { %v352_v49 = vsel %vm351_vm1, %v346_v48, %v348_v29  ;;  %v429_v50 = vpop.permute.xlu0 %428 }
 0x150   : > { %356 = vst [vmem:[#allocation3 + $0x10] sm:$0xf0] %v352_v49  ;;  %v433_v51 = vsel %vm432_vm3, %v427_v33, %v429_v50  ;;  %v434_v52 = vsel %vm432_vm3, %v429_v50, %v431_v25  ;;  %v498_v54 = vld [vmem:[#allocation3 + $0x18] sm:$0xff] }
 0x151   : > { %437 = vst [vmem:[#allocation3 + $0x30] sm:$0xf] %v433_v51  ;;  %438 = vst [vmem:[#allocation3 + $0x38] sm:$0xf] %v434_v52  ;;  %v701_v55 = vpack.c.bf16 %v498_v54, %v496_v53 }
 0x152   : > { %v400_v56 = vpop.permute.xlu1 %399 }
 0x153   : > { %v406_v57 = vsel %vm405_vm13, %v400_v56, %v402_v26  ;;  %v484_v58 = vpop.permute.xlu0 %483  ;;  %702 = vmatprep.subr.bf16.mxu0 %v701_v55  ;;  %v495_v62 = vld [vmem:[#allocation3] sm:$0xff] }
 0x154   : > { %410 = vst [vmem:[#allocation3 + $0x20] sm:$0xf0] %v406_v57  ;;  %v500_v2 = vld [vmem:[#allocation3 + $0x28] sm:$0xff] }
 0x156   : > { %v455_v59 = vpop.permute.xlu1 %454 }
 0x157   : > { %v461_v60 = vsel %vm460_vm14, %v455_v59, %v457_v28  ;;  %v482_v61 = vpop.permute.xlu0 %481  ;;  %v497_v63 = vld [vmem:[#allocation3 + $0x10] sm:$0xff] }
 0x158   : > { %465 = vst [vmem:[#allocation3 + $0x30] sm:$0xf0] %v461_v60  ;;  %v488_v0 = vsel %vm487_vm4, %v482_v61, %v484_v58  ;;  %v703_v1 = vpack.c.bf16 %v497_v63, %v495_v62  ;;  %v502_v3 = vld [vmem:[#allocation3 + $0x38] sm:$0xff] }
 0x159   : > { %492 = vst [vmem:[#allocation3 + $0x40] sm:$0xf] %v488_v0  ;;  %v705_v4 = vpack.c.bf16 %v502_v3, %v500_v2 }
 0x15a   : > { %v486_v5 = vpop.permute.xlu1 %485  ;;  %704 = vmatpush1.bf16.msra.mxu0 %v703_v1 }
 0x15b   : > { %v489_v6 = vsel %vm487_vm4, %v484_v58, %v486_v5  ;;  %706 = vmatprep.subr.bf16.mxu0 %v705_v4  ;;  %v499_v7 = vld [vmem:[#allocation3 + $0x20] sm:$0xff] }
 0x15c   : > { %493 = vst [vmem:[#allocation3 + $0x48] sm:$0xf] %v489_v6 }
 0x15f   : > { %v501_v8 = vld [vmem:[#allocation3 + $0x30] sm:$0xff] }
 0x160   : > { %v707_v9 = vpack.c.bf16 %v501_v8, %v499_v7  ;;  %v503_v12 = vld [vmem:[#allocation3 + $0x40] sm:$0xf] }
 0x162   : > { %708 = vmatpush1.bf16.msra.mxu0 %v707_v9 }
 0x163   : > { %v504_v10 = vld [vmem:[#allocation3 + $0x48] sm:$0xf] }
 0x164   : > { %691 = vmatprep.subr.msk.mxu0 %vm515_vm5, %v504_v10 }
 0x166   : > { %692 = vmatpush1.msk.msra.mxu0 %vm515_vm5, %v503_v12 }
 0x167   : > { %693 = vmatmul.mubr.msk.f32.vlgmr.msra.gmra.mrb[0].mxu0 %vm511_vm6, %v494_v11 }
 0x16b   : > { %v509_v13 = vpop.permute.xlu1 %508 }
 0x23a   : > { %v588_v14 = vpop.f32.mrb[0].mxu0 }
 0x23b   : > { %v589_v15 = vadd.f32 %v588_v14, %v509_v13  ;;  %v590_v16 = vpop.f32.mrb[1].mxu0 }
 0x23c   : > { %v591_v17 = vadd.f32 %v590_v16, %v509_v13 }
 0x23d   : > { %593 = vst [vmem:[%s213_s6] sm:$0xff] %v589_v15 }
 0x23e   : > { %594 = vst [vmem:[%s213_s6 + $0x8] sm:$0xff] %v591_v17 }
 0x23f   : > { %818 = shalt.err (!%p815_p4)
}
 0x240   : > { %s819_s7 = scalar_lea.hbm %s1101_s8, 256  ;;  %s823_s23 = scalar_lea.hbm %s1149_s4, 512 }
 0x241   : > { %p820_p5 = scmp.ne.s32.totalorder %s1101_s8, %s819_s7  ;;  %p824_p0 = scmp.lt.u32.totalorder %s1101_s8, %s1149_s4 }
 0x242   : > { %p825_p1 = scmp.lt.u32.totalorder %s823_s23, %s819_s7  ;;  %p827_p6 = scmp.lt.u32.totalorder %s819_s7, %s1101_s8 }
 0x243   : > { %p821_p8 = pnand %p820_p5, %p1158_p11 }
 0x244   : > { %p826_p3 = por %p825_p1, %p824_p0 }
 0x245   : > { %p822_p9 = pneg %p821_p8 }
 0x246   : > { %p828_p12 = por %p827_p6, %p826_p3 }
 0x248   : > { %p829_p13 = pnand %p828_p12, %p822_p9 }
 0x24a   : > { %832 = shalt.err (!%p829_p13)
}
 0x24b   : > { %711 = dma.vmem_to_hbm [thread:$0]  (%p1158_p11), %s1103_s9, 256, %s1101_s8, %s596_s10  }
 0x24c PF: > { %s622_s30 = sand.u32 1, %s859_s15   ;;  %p1159_p7 = scmp.ne.s32.totalorder %s1154_s28, 0 }
 0x24d   : > { %p1160_p10 = scmp.ge.s32.totalorder %s871_s18, 2  ;;  %s623_s5 = scalar_lea.sflag [#allocation6], %s622_s30 }
 0x24f   : > { %p718_p2 = pnand %p1160_p10, %p1159_p7 }
 0x251   : > { %854 = dma.done.wait (!%p718_p2), %s623_s5, 256  }
 0x252   : > { %856 = vsyncadd (!%p718_p2), %s623_s5, 4294967040  ;;  %p17_p4 = scmp.ge.s32.totalorder %s943_s21, 4   ;;  %s1161_s15 = smov %s863_s16 }
 0x253   : > { %s1162_s16 = smov %s867_s17  ;;  %s1163_s17 = smov %s955_s24 }
 0x254   : > { %s1164_s18 = smov %s943_s21  ;;  %19 = sbr.rel (!%p17_p4) target bundleno = 5 (0x5), region = 83 }
 0x25b   :  { %628 = vsyncpa [#allocation5], 1 }
 0x25c   :  { %630 = vsyncpa [#allocation5 + $0x1], 1 }
 0x25d   :  { %631 = vsyncpa [#allocation6], 1 }
 0x25e   :  { %633 = vsyncpa [#allocation6 + $0x1], 1 }

</bundles_post_ra>
